<compile_context>
chip_gen: v7x
topology: tpu7x:2x2x1
jax: 0.10.0
libtpu: 0.0.40
codegen_flags: <defaults>
</compile_context>

<pallas_src>
import math
import numpy as np
import jax
import jax.numpy as jnp
from jax.experimental import pallas as pl
from jax.experimental.pallas import tpu as pltpu


# ----------------------------------------------------------------------------
# Pallas kernel: fused 5-layer MLP forward (BN already folded into W/b)
# ----------------------------------------------------------------------------
def dnn5l_kernel(x_ref,
                 w1_ref, b1_ref,
                 w2_ref, b2_ref,
                 w3_ref, b3_ref,
                 w4_ref, b4_ref,
                 w5t_ref, b5t_ref,
                 out_ref):
    """Forward for one batch tile.

    Layers 1-4: h <- relu(h @ W_i + b_i)       (batch rows on sublanes, features on lanes)
    Layer 5   : out_t <- W5t @ h.T + b5t        (emitted transposed -> lane-dense store)
    """
    def layer(h, w_ref, b_ref):
        # Cast activations to the weight dtype (no-op for f32, bf16 on the MXU
        # otherwise); always accumulate in f32.
        z = jnp.dot(h.astype(w_ref.dtype), w_ref[...],
                    preferred_element_type=jnp.float32) + b_ref[...]
        return jnp.maximum(z, 0.0)

    h = x_ref[...]
    h = layer(h, w1_ref, b1_ref)
    h = layer(h, w2_ref, b2_ref)
    h = layer(h, w3_ref, b3_ref)
    h = layer(h, w4_ref, b4_ref)
    # Final n_l4 -> out_size layer in transposed orientation. The small
    # (tile_b, n_l4) -> (n_l4, tile_b) transpose runs on the XLU and hides under
    # the x DMA; the payoff is an unmasked, lane-dense (out_size, tile_b) store
    # and a contiguous HBM writeback instead of a 4-B strided one.
    out_t = jnp.dot(w5t_ref[...], h.astype(w5t_ref.dtype).T,
                    preferred_element_type=jnp.float32) + b5t_ref[...]
    out_ref[...] = out_t.astype(out_ref.dtype)


# ----------------------------------------------------------------------------
# Wrapper
# ----------------------------------------------------------------------------
def _round_up(v, m):
    return ((v + m - 1) // m) * m


def _full_block(arr):
    """Full-array block with a constant index_map (stays VMEM-resident across steps).

    TODO(synk): pipeline_mode=pl.Buffered(1) would also drop the unused second
    buffer (~30 KiB) for these loop-invariant blocks; constant index_maps already
    avoid per-step re-DMA, so the default buffering is kept for portability.
    """
    nd = arr.ndim
    return pl.BlockSpec(arr.shape, lambda i, _nd=nd: (0,) * _nd)


def dnn5l_forward(x, folded_params, *, tile_b=None, compute_dtype=jnp.bfloat16):
    """x: [B, input_size]. folded_params: dict w1..w5, b1..b5 (BN folded in).

    compute_dtype: bf16 by default (MXU-native operands; halves x HBM bytes when
    x is already stored in bf16 -- supply x in bf16 to avoid an extra cast pass).
    Accumulation is always f32; biases stay f32. Use jnp.float32 for exact math.
    """
    B, D = x.shape
    out_size = folded_params["w5"].shape[1]

    if x.dtype != compute_dtype:
        x = x.astype(compute_dtype)
    ws = [folded_params[f"w{i}"].astype(compute_dtype) for i in range(1, 5)]   # (in, out)
    bs = [folded_params[f"b{i}"].astype(jnp.float32) for i in range(1, 5)]     # (1, out)
    w5t = jnp.transpose(folded_params["w5"]).astype(compute_dtype)             # (out_size, n_l4)
    b5t = folded_params["b5"].reshape(out_size, 1).astype(jnp.float32)         # (out_size, 1)

    # Batch tiling. The kernel is HBM/overhead-bound at these feature widths, so
    # favor big 256-aligned tiles; for large B keep >=2 grid steps so the
    # "parallel" batch axis can be sharded across v7x's two TensorCores.
    if tile_b is None:
        if B <= 256:
            tile_b = B
        else:
            tile_b = min(2048, _round_up(pl.cdiv(B, 2), 256))
    else:
        tile_b = max(8, min(tile_b, B))
        if tile_b < B:
            tile_b = max(8, (tile_b // 8) * 8)   # sublane-aligned floor
    grid = (pl.cdiv(B, tile_b),)

    args = [x]
    in_specs = [pl.BlockSpec((tile_b, D), lambda i: (i, 0))]
    for w, b in zip(ws, bs):
        args += [w, b]
        in_specs += [_full_block(w), _full_block(b)]
    args += [w5t, b5t]
    in_specs += [_full_block(w5t), _full_block(b5t)]

    # Lane-dense output slab: (out_size, B); each grid step writes a full
    # (out_size, tile_b) block (ragged tail is masked only on the HBM writeback).
    out_spec = pl.BlockSpec((out_size, tile_b), lambda i: (0, i))

    feat = [D] + [w.shape[1] for w in ws] + [out_size]
    flops = 2 * B * sum(feat[i] * feat[i + 1] for i in range(5))
    bytes_accessed = int(sum(int(a.size) * a.dtype.itemsize for a in args)
                         + B * out_size * 4)
    cost = pl.CostEstimate(flops=flops, transcendentals=0,
                           bytes_accessed=bytes_accessed)

    out_t = pl.pallas_call(
        dnn5l_kernel,
        out_shape=jax.ShapeDtypeStruct((out_size, B), jnp.float32),
        grid=grid,
        in_specs=in_specs,
        out_specs=out_spec,
        cost_estimate=cost,
        # Sub-MiB VMEM footprint even at tile_b=2048 -> default scoped limit is
        # plenty on every generation (incl. v5e's 16 MiB).
        compiler_params=pltpu.CompilerParams(
            dimension_semantics=("parallel",)),
    )(*args)
    return out_t.T   # (B, out_size); trivial layout plumbing (out_size is tiny)


# ----------------------------------------------------------------------------
# Deterministic parameter construction (mirrors dnn_5l.__init__, eval mode)
# ----------------------------------------------------------------------------
def make_raw_params(key, input_size, n_l1, n_l2, n_l3, n_l4, output_size=1, eps=1e-5):
    dims = [input_size, n_l1, n_l2, n_l3, n_l4, output_size]
    keys = jax.random.split(key, 10)
    p = {}
    for i in range(5):
        fan_in, fan_out = dims[i], dims[i + 1]
        # Xavier-uniform weight (PyTorch weight is [out, in]; stored transposed).
        bound = math.sqrt(6.0 / (fan_in + fan_out))
        w = jax.random.uniform(keys[2 * i], (fan_in, fan_out), jnp.float32, -bound, bound)
        # nn.Linear default bias init: U(-1/sqrt(fan_in), 1/sqrt(fan_in))
        bb = 1.0 / math.sqrt(fan_in)
        b = jax.random.uniform(keys[2 * i + 1], (1, fan_out), jnp.float32, -bb, bb)
        p[f"w{i + 1}"] = w
        p[f"b{i + 1}"] = b
        if i < 4:
            # BatchNorm1d eval mode: gamma=1, beta=0, running_mean=0, running_var=1
            gamma = jnp.ones((1, fan_out), jnp.float32)
            beta = jnp.zeros((1, fan_out), jnp.float32)
            rmean = jnp.zeros((1, fan_out), jnp.float32)
            rvar = jnp.ones((1, fan_out), jnp.float32)
            scale = gamma / jnp.sqrt(rvar + eps)
            shift = beta - rmean * scale
            p[f"s{i + 1}"] = scale
            p[f"t{i + 1}"] = shift
    return p


def fold_bn_into_linear(p):
    """Fold y = ReLU(xW_i+b_i)*s_i + t_i followed by W_{i+1} into W'_{i+1}, b'_{i+1}.

    W'_{i+1} = diag(s_i) @ W_{i+1};  b'_{i+1} = b_{i+1} + t_i @ W_{i+1}.
    Exact algebraic rewrite of the eval-mode forward pass.
    """
    f = {"w1": p["w1"], "b1": p["b1"]}
    for i in range(2, 6):
        s = p[f"s{i - 1}"]
        t = p[f"t{i - 1}"]
        w = p[f"w{i}"]
        b = p[f"b{i}"]
        f[f"w{i}"] = w * s.reshape(-1, 1)
        f[f"b{i}"] = b + t @ w
    return f


def reference_forward_np(x, p):
    """Un-fused float64 numpy reference matching the PyTorch module in eval mode."""
    h = np.asarray(x, np.float64)
    pn = {k: np.asarray(v, np.float64) for k, v in p.items()}
    for i in range(1, 5):
        h = np.maximum(h @ pn[f"w{i}"] + pn[f"b{i}"], 0.0)
        h = h * pn[f"s{i}"] + pn[f"t{i}"]
    return h @ pn["w5"] + pn["b5"]


if __name__ == "__main__":
    input_size, n_l1, n_l2, n_l3, n_l4, output_size = 64, 64, 32, 32, 16, 1

    key = jax.random.PRNGKey(0)
    kx, kp = jax.random.split(key)

    raw = make_raw_params(kp, input_size, n_l1, n_l2, n_l3, n_l4, output_size)
    folded = fold_bn_into_linear(raw)

    # Case 1: tiny batch, f32 operands, single grid step, full-array blocks.
    b1 = 16
    x1 = jax.random.normal(kx, (b1, input_size), jnp.float32)
    out1 = jax.block_until_ready(dnn5l_forward(x1, folded, compute_dtype=jnp.float32))
    ref1 = reference_forward_np(np.asarray(x1), raw)
    assert out1.shape == (b1, output_size)
    # Loose-ish tolerance to stay robust to MXU multi-pass f32 matmul precision.
    np.testing.assert_allclose(np.asarray(out1), ref1, rtol=1e-2, atol=1e-3)

    # Case 2: multi-tile ragged batch, default bf16 operands (2 grid steps so
    # both v7x TensorCores get work; last tile ragged -> masked writeback only).
    b2 = 300
    x2 = jax.random.normal(jax.random.fold_in(kx, 1), (b2, input_size), jnp.float32)
    x2_bf16 = x2.astype(jnp.bfloat16)
    out2 = jax.block_until_ready(dnn5l_forward(x2_bf16, folded))
    ref2 = reference_forward_np(np.asarray(x2_bf16.astype(jnp.float32)), raw)
    assert out2.shape == (b2, output_size)
    np.testing.assert_allclose(np.asarray(out2), ref2, rtol=1e-1, atol=5e-2)

    print("KERNEL_OK")
</pallas_src>

<mosaic_0001>
module attributes {stable_mosaic.version = 11 : i64} {
  func.func @dnn5l_kernel(%arg0: i32, %arg1: memref<16x64xf32, #tpu.memory_space<vmem>>, %arg2: memref<64x64xf32, #tpu.memory_space<vmem>>, %arg3: memref<1x64xf32, #tpu.memory_space<vmem>>, %arg4: memref<64x32xf32, #tpu.memory_space<vmem>>, %arg5: memref<1x32xf32, #tpu.memory_space<vmem>>, %arg6: memref<32x32xf32, #tpu.memory_space<vmem>>, %arg7: memref<1x32xf32, #tpu.memory_space<vmem>>, %arg8: memref<32x16xf32, #tpu.memory_space<vmem>>, %arg9: memref<1x16xf32, #tpu.memory_space<vmem>>, %arg10: memref<1x16xf32, #tpu.memory_space<vmem>>, %arg11: memref<1x1xf32, #tpu.memory_space<vmem>>, %arg12: memref<1x16xf32, #tpu.memory_space<vmem>>) attributes {dimension_semantics = [#tpu.dimension_semantics<parallel>], iteration_bounds = array<i64: 1>, scalar_prefetch = 0 : i64, scratch_operands = 0 : i64, tpu.core_type = #tpu.core_type<tc>, window_params = [{transform_indices = @transform_0, window_bounds = array<i64: 16, 64>}, {pipeline_mode = #tpu.pipeline_mode<synchronous>, transform_indices = @transform_1, window_bounds = array<i64: 64, 64>}, {pipeline_mode = #tpu.pipeline_mode<synchronous>, transform_indices = @transform_2, window_bounds = array<i64: 1, 64>}, {pipeline_mode = #tpu.pipeline_mode<synchronous>, transform_indices = @transform_3, window_bounds = array<i64: 64, 32>}, {pipeline_mode = #tpu.pipeline_mode<synchronous>, transform_indices = @transform_4, window_bounds = array<i64: 1, 32>}, {pipeline_mode = #tpu.pipeline_mode<synchronous>, transform_indices = @transform_5, window_bounds = array<i64: 32, 32>}, {pipeline_mode = #tpu.pipeline_mode<synchronous>, transform_indices = @transform_6, window_bounds = array<i64: 1, 32>}, {pipeline_mode = #tpu.pipeline_mode<synchronous>, transform_indices = @transform_7, window_bounds = array<i64: 32, 16>}, {pipeline_mode = #tpu.pipeline_mode<synchronous>, transform_indices = @transform_8, window_bounds = array<i64: 1, 16>}, {pipeline_mode = #tpu.pipeline_mode<synchronous>, transform_indices = @transform_9, window_bounds = array<i64: 1, 16>}, {pipeline_mode = #tpu.pipeline_mode<synchronous>, transform_indices = @transform_10, window_bounds = array<i64: 1, 1>}, {transform_indices = @transform_11, window_bounds = array<i64: 1, 16>}]} {
    %c0 = arith.constant 0 : index
    %c0_0 = arith.constant 0 : index
    %0 = vector.load %arg1[%c0, %c0_0] : memref<16x64xf32, #tpu.memory_space<vmem>>, vector<16x64xf32>
    %c0_1 = arith.constant 0 : index
    %c0_2 = arith.constant 0 : index
    %1 = vector.load %arg2[%c0_1, %c0_2] : memref<64x64xf32, #tpu.memory_space<vmem>>, vector<64x64xf32>
    %cst = arith.constant dense<0.000000e+00> : vector<16x64xf32>
    %2 = tpu.matmul %0, %1, %cst {dimension_numbers = #tpu.dot_dimension_numbers<[1], [0], [0], [1], [0, 0, 1, 1], [], []>} : vector<16x64xf32>, vector<64x64xf32>, vector<16x64xf32> -> vector<16x64xf32>
    %c0_3 = arith.constant 0 : index
    %c0_4 = arith.constant 0 : index
    %3 = vector.load %arg3[%c0_3, %c0_4] : memref<1x64xf32, #tpu.memory_space<vmem>>, vector<1x64xf32>
    %4 = vector.broadcast %3 : vector<1x64xf32> to vector<16x64xf32>
    %5 = arith.addf %2, %4 : vector<16x64xf32>
    %cst_5 = arith.constant 0.000000e+00 : f32
    %6 = vector.broadcast %cst_5 : f32 to vector<16x64xf32>
    %7 = arith.maximumf %5, %6 : vector<16x64xf32>
    %c0_6 = arith.constant 0 : index
    %c0_7 = arith.constant 0 : index
    %8 = vector.load %arg4[%c0_6, %c0_7] : memref<64x32xf32, #tpu.memory_space<vmem>>, vector<64x32xf32>
    %cst_8 = arith.constant dense<0.000000e+00> : vector<16x32xf32>
    %9 = tpu.matmul %7, %8, %cst_8 {dimension_numbers = #tpu.dot_dimension_numbers<[1], [0], [0], [1], [0, 0, 1, 1], [], []>} : vector<16x64xf32>, vector<64x32xf32>, vector<16x32xf32> -> vector<16x32xf32>
    %c0_9 = arith.constant 0 : index
    %c0_10 = arith.constant 0 : index
    %10 = vector.load %arg5[%c0_9, %c0_10] : memref<1x32xf32, #tpu.memory_space<vmem>>, vector<1x32xf32>
    %11 = vector.broadcast %10 : vector<1x32xf32> to vector<16x32xf32>
    %12 = arith.addf %9, %11 : vector<16x32xf32>
    %cst_11 = arith.constant 0.000000e+00 : f32
    %13 = vector.broadcast %cst_11 : f32 to vector<16x32xf32>
    %14 = arith.maximumf %12, %13 : vector<16x32xf32>
    %c0_12 = arith.constant 0 : index
    %c0_13 = arith.constant 0 : index
    %15 = vector.load %arg6[%c0_12, %c0_13] : memref<32x32xf32, #tpu.memory_space<vmem>>, vector<32x32xf32>
    %cst_14 = arith.constant dense<0.000000e+00> : vector<16x32xf32>
    %16 = tpu.matmul %14, %15, %cst_14 {dimension_numbers = #tpu.dot_dimension_numbers<[1], [0], [0], [1], [0, 0, 1, 1], [], []>} : vector<16x32xf32>, vector<32x32xf32>, vector<16x32xf32> -> vector<16x32xf32>
    %c0_15 = arith.constant 0 : index
    %c0_16 = arith.constant 0 : index
    %17 = vector.load %arg7[%c0_15, %c0_16] : memref<1x32xf32, #tpu.memory_space<vmem>>, vector<1x32xf32>
    %18 = vector.broadcast %17 : vector<1x32xf32> to vector<16x32xf32>
    %19 = arith.addf %16, %18 : vector<16x32xf32>
    %cst_17 = arith.constant 0.000000e+00 : f32
    %20 = vector.broadcast %cst_17 : f32 to vector<16x32xf32>
    %21 = arith.maximumf %19, %20 : vector<16x32xf32>
    %c0_18 = arith.constant 0 : index
    %c0_19 = arith.constant 0 : index
    %22 = vector.load %arg8[%c0_18, %c0_19] : memref<32x16xf32, #tpu.memory_space<vmem>>, vector<32x16xf32>
    %cst_20 = arith.constant dense<0.000000e+00> : vector<16x16xf32>
    %23 = tpu.matmul %21, %22, %cst_20 {dimension_numbers = #tpu.dot_dimension_numbers<[1], [0], [0], [1], [0, 0, 1, 1], [], []>} : vector<16x32xf32>, vector<32x16xf32>, vector<16x16xf32> -> vector<16x16xf32>
    %c0_21 = arith.constant 0 : index
    %c0_22 = arith.constant 0 : index
    %24 = vector.load %arg9[%c0_21, %c0_22] : memref<1x16xf32, #tpu.memory_space<vmem>>, vector<1x16xf32>
    %25 = vector.broadcast %24 : vector<1x16xf32> to vector<16x16xf32>
    %26 = arith.addf %23, %25 : vector<16x16xf32>
    %cst_23 = arith.constant 0.000000e+00 : f32
    %27 = vector.broadcast %cst_23 : f32 to vector<16x16xf32>
    %28 = arith.maximumf %26, %27 : vector<16x16xf32>
    %c0_24 = arith.constant 0 : index
    %c0_25 = arith.constant 0 : index
    %29 = vector.load %arg10[%c0_24, %c0_25] : memref<1x16xf32, #tpu.memory_space<vmem>>, vector<1x16xf32>
    %30 = tpu.transpose %28, [1, 0] : vector<16x16xf32> -> vector<16x16xf32>
    %cst_26 = arith.constant dense<0.000000e+00> : vector<1x16xf32>
    %31 = tpu.matmul %29, %30, %cst_26 {dimension_numbers = #tpu.dot_dimension_numbers<[1], [0], [0], [1], [0, 0, 1, 1], [], []>} : vector<1x16xf32>, vector<16x16xf32>, vector<1x16xf32> -> vector<1x16xf32>
    %c0_27 = arith.constant 0 : index
    %c0_28 = arith.constant 0 : index
    %32 = vector.load %arg11[%c0_27, %c0_28] : memref<1x1xf32, #tpu.memory_space<vmem>>, vector<1x1xf32>
    %33 = vector.broadcast %32 : vector<1x1xf32> to vector<1x16xf32>
    %34 = arith.addf %31, %33 : vector<1x16xf32>
    %c0_29 = arith.constant 0 : index
    %c0_30 = arith.constant 0 : index
    %35 = vector.load %arg12[%c0_29, %c0_30] : memref<1x16xf32, #tpu.memory_space<vmem>>, vector<1x16xf32>
    tpu.vector_store %arg12[%c0_29, %c0_30], %34 {strides = array<i32>} : memref<1x16xf32, #tpu.memory_space<vmem>>, vector<1x16xf32>,
    return
  }
  func.func @transform_0(%arg0: i32) -> (i32, i32) {
    %c0_i32 = arith.constant 0 : i32
    %c0_i32_0 = arith.constant 0 : i32
    return %arg0, %c0_i32 : i32, i32
  }
  func.func @transform_1(%arg0: i32) -> (i32, i32) {
    %c0_i32 = arith.constant 0 : i32
    %c0_i32_0 = arith.constant 0 : i32
    %c0_i32_1 = arith.constant 0 : i32
    return %c0_i32, %c0_i32_0 : i32, i32
  }
  func.func @transform_2(%arg0: i32) -> (i32, i32) {
    %c0_i32 = arith.constant 0 : i32
    %c0_i32_0 = arith.constant 0 : i32
    %c0_i32_1 = arith.constant 0 : i32
    return %c0_i32, %c0_i32_0 : i32, i32
  }
  func.func @transform_3(%arg0: i32) -> (i32, i32) {
    %c0_i32 = arith.constant 0 : i32
    %c0_i32_0 = arith.constant 0 : i32
    %c0_i32_1 = arith.constant 0 : i32
    return %c0_i32, %c0_i32_0 : i32, i32
  }
  func.func @transform_4(%arg0: i32) -> (i32, i32) {
    %c0_i32 = arith.constant 0 : i32
    %c0_i32_0 = arith.constant 0 : i32
    %c0_i32_1 = arith.constant 0 : i32
    return %c0_i32, %c0_i32_0 : i32, i32
  }
  func.func @transform_5(%arg0: i32) -> (i32, i32) {
    %c0_i32 = arith.constant 0 : i32
    %c0_i32_0 = arith.constant 0 : i32
    %c0_i32_1 = arith.constant 0 : i32
    return %c0_i32, %c0_i32_0 : i32, i32
  }
  func.func @transform_6(%arg0: i32) -> (i32, i32) {
    %c0_i32 = arith.constant 0 : i32
    %c0_i32_0 = arith.constant 0 : i32
    %c0_i32_1 = arith.constant 0 : i32
    return %c0_i32, %c0_i32_0 : i32, i32
  }
  func.func @transform_7(%arg0: i32) -> (i32, i32) {
    %c0_i32 = arith.constant 0 : i32
    %c0_i32_0 = arith.constant 0 : i32
    %c0_i32_1 = arith.constant 0 : i32
    return %c0_i32, %c0_i32_0 : i32, i32
  }
  func.func @transform_8(%arg0: i32) -> (i32, i32) {
    %c0_i32 = arith.constant 0 : i32
    %c0_i32_0 = arith.constant 0 : i32
    %c0_i32_1 = arith.constant 0 : i32
    return %c0_i32, %c0_i32_0 : i32, i32
  }
  func.func @transform_9(%arg0: i32) -> (i32, i32) {
    %c0_i32 = arith.constant 0 : i32
    %c0_i32_0 = arith.constant 0 : i32
    %c0_i32_1 = arith.constant 0 : i32
    return %c0_i32, %c0_i32_0 : i32, i32
  }
  func.func @transform_10(%arg0: i32) -> (i32, i32) {
    %c0_i32 = arith.constant 0 : i32
    %c0_i32_0 = arith.constant 0 : i32
    %c0_i32_1 = arith.constant 0 : i32
    return %c0_i32, %c0_i32_0 : i32, i32
  }
  func.func @transform_11(%arg0: i32) -> (i32, i32) {
    %c0_i32 = arith.constant 0 : i32
    %c0_i32_0 = arith.constant 0 : i32
    return %c0_i32, %arg0 : i32, i32
  }
}

</mosaic_0001>

<bundles_post_ra>
// kernel: tpu_custom_call.1
= control target key start
LH: loop header
LB: loop body
LE: loop exit
PB: predicated region body
PF: predicated region fallthrough
CT: control target
= control target key end

     0   :  { %s916_s0 = inlined_call_operand.vmem [shape: f32[16,64], index: 0, kind: input, shape index: {}]   ;;  %s917_s1 = inlined_call_operand.vmem [shape: f32[64,64], index: 1, kind: input, shape index: {}]   ;;  %s918_s2 = inlined_call_operand.vmem [shape: f32[1,64], index: 2, kind: input, shape index: {}]   ;;  %s919_s3 = inlined_call_operand.vmem [shape: f32[64,32], index: 3, kind: input, shape index: {}]   ;;  %s920_s4 = inlined_call_operand.vmem [shape: f32[1,32], index: 4, kind: input, shape index: {}]   ;;  %s921_s5 = inlined_call_operand.vmem [shape: f32[32,32], index: 5, kind: input, shape index: {}]   ;;  %s922_s6 = inlined_call_operand.vmem [shape: f32[1,32], index: 6, kind: input, shape index: {}]   ;;  %s923_s7 = inlined_call_operand.vmem [shape: f32[32,16], index: 7, kind: input, shape index: {}]   ;;  %s924_s8 = inlined_call_operand.vmem [shape: f32[1,16], index: 8, kind: input, shape index: {}]   ;;  %s925_s9 = inlined_call_operand.vmem [shape: f32[1,16], index: 9, kind: input, shape index: {}]   ;;  %s926_s10 = inlined_call_operand.<no memory space> [shape: f32[1,1], index: 10, kind: input, shape index: {}]   ;;  %s927_s11 = inlined_call_operand.hbm [shape: f32[1,16], index: 11, kind: output, shape index: {}]  }
   0x1   :  { %v16_v0 = vstv %s926_s10 }
   0x2   :  { %17 = vst [vmem:[#allocation2] sm:$0x1] %v16_v0 }
   0x3   :  { %v43_v1 = vld [vmem:[%s917_s1] sm:$0xff]  ;;  %v44_v2 = vld [vmem:[%s917_s1 + $0x8] sm:$0xff]  ;;  %v45_v3 = vld [vmem:[%s917_s1 + $0x10] sm:$0xff]  ;;  %vm58_vm0 = vcmask 523264  }
   0x4   :  { %v653_v4 = vpack.c.bf16 %v44_v2, %v43_v1  ;;  %v46_v5 = vld [vmem:[%s917_s1 + $0x18] sm:$0xff]  ;;  %v47_v7 = vld [vmem:[%s917_s1 + $0x20] sm:$0xff]  ;;  %v48_v8 = vld [vmem:[%s917_s1 + $0x28] sm:$0xff] }
   0x5   :  { %v657_v6 = vpack.c.bf16 %v46_v5, %v45_v3  ;;  %v41_v9 = vld [vmem:[%s916_s0] sm:$0xff]  ;;  %v143_v11 = vld [vmem:[%s919_s3 + $0x8] sm:$0xff]  ;;  %v144_v13 = vld [vmem:[%s919_s3 + $0x10] sm:$0xff]  ;;  %v661_v15 = vpack.c.bf16 %v48_v8, %v47_v7 }
   0x6   :  { %654 = vmatprep.subr.bf16.mxu0 %v653_v4  ;;  %602 = vmatprep.mubr.msk.f32.mxu0 %vm58_vm0, %v41_v9  ;;  %v142_v10 = vld [vmem:[%s919_s3] sm:$0xff]  ;;  %v145_v14 = vld [vmem:[%s919_s3 + $0x18] sm:$0xff]  ;;  %v147_v18 = vld [vmem:[%s919_s3 + $0x28] sm:$0xff] }
   0x7   :  { %656 = vmatpush3.bf16.msra.mxu0 %v653_v4  ;;  %v669_v12 = vpack.c.bf16 %v143_v11, %v142_v10  ;;  %v673_v16 = vpack.c.bf16 %v145_v14, %v144_v13  ;;  %v146_v17 = vld [vmem:[%s919_s3 + $0x20] sm:$0xff] }
   0x8   :  { %658 = vmatprep.subr.bf16.mxu0 %v657_v6 }
   0x9   :  { %18 = vsyncpa [#allocation4], 0  ;;  %v49_v19 = vld [vmem:[%s917_s1 + $0x30] sm:$0xff]  ;;  %v50_v20 = vld [vmem:[%s917_s1 + $0x38] sm:$0xff]  ;;  %670 = vmatprep.subr.bf16.mxu1 %v669_v12  ;;  %v677_v21 = vpack.c.bf16 %v147_v18, %v146_v17  ;;  %vm251_vm1 = vcmask 261120   ;;  %v735_v60 = vmov 0.0|0.0   ;;  %v436_v9 = vlaneseq }
   0xa   :  { %672 = vmatpush3.bf16.msra.mxu1 %v669_v12  ;;  %v665_v22 = vpack.c.bf16 %v50_v20, %v49_v19  ;;  %v42_v23 = vld [vmem:[%s916_s0 + $0x8] sm:$0xff]  ;;  %v148_v24 = vld [vmem:[%s919_s3 + $0x30] sm:$0xff]  ;;  %v149_v25 = vld [vmem:[%s919_s3 + $0x38] sm:$0xff]  ;;  %vm736_vm2 = vmmov 0   ;;  %v737_v61 = vmov 0.0   ;;  %v738_v63 = vmov 0  }
   0xb   :  { %660 = vmatpush3.bf16.msra.mxu0 %v657_v6  ;;  %674 = vmatprep.subr.bf16.mxu1 %v673_v16  ;;  %v681_v26 = vpack.c.bf16 %v149_v25, %v148_v24  ;;  %v240_v27 = vld [vmem:[%s921_s5] sm:$0xff]  ;;  %v241_v28 = vld [vmem:[%s921_s5 + $0x8] sm:$0xff]  ;;  %v242_v37 = vld [vmem:[%s921_s5 + $0x10] sm:$0xff]  ;;  %vm440_vm3 = vcmask 130048   ;;  %v437_v10 = vshrl.u32 %v436_v9, 7  ;;  %vm520_vm5 = vcmask 122880  }
   0xc   :  { %662 = vmatprep.subr.bf16.mxu0 %v661_v15  ;;  %v685_v29 = vpack.c.bf16 %v241_v28, %v240_v27  ;;  %v536_v30 = vld [vmem:[%s918_s2] ss:$0 sm:$0xff]  ;;  %v243_v38 = vld [vmem:[%s921_s5 + $0x18] sm:$0xff]  ;;  %v336_v41 = vld [vmem:[%s923_s7 + $0x8] sm:$0xff]  ;;  %710 = vset.pattern.permute.xlu0 %v738_v63 }
   0xd   :  { %v689_v39 = vpack.c.bf16 %v243_v38, %v242_v37  ;;  %v335_v40 = vld [vmem:[%s923_s7] sm:$0xff]  ;;  %v337_v50 = vld [vmem:[%s923_s7 + $0x10] sm:$0xff]  ;;  %v338_v51 = vld [vmem:[%s923_s7 + $0x18] sm:$0xff]  ;;  %v438_v11 = vsub.s32 0, %v437_v10 }
   0xe   :  { %676 = vmatpush3.bf16.msra.mxu1 %v673_v16  ;;  %v693_v42 = vpack.c.bf16 %v336_v41, %v335_v40  ;;  %v539_v43 = vld [vmem:[%s920_s4] ss:$0 sm:$0xff]  ;;  %v697_v52 = vpack.c.bf16 %v338_v51, %v337_v50  ;;  %vm703_vm4 = vmpackc.low %vm440_vm3, %vm440_vm3 }
   0xf   :  { %664 = vmatpush3.bf16.msra.mxu0 %v661_v15  ;;  %678 = vmatprep.subr.bf16.mxu1 %v677_v21  ;;  %v542_v53 = vld [vmem:[%s922_s6] ss:$0 sm:$0xff] }
  0x10   :  { %666 = vmatprep.subr.bf16.mxu0 %v665_v22  ;;  %v430_v62 = vld [vmem:[#allocation2] sm:$0x1] }
  0x11   :  { %433 = vperm.xlu0 %710, %v430_v62   ;;  %v545_v0 = vld [vmem:[%s924_s8] ss:$0 sm:$0xff]  ;;  %s739_s8 = smov [#allocation3]  }
  0x12   :  { %680 = vmatpush3.bf16.msra.mxu1 %v677_v21  ;;  %v429_v8 = vld [vmem:[%s925_s9] sm:$0x1]  ;;  %s528_s12 = sshll.u32 %s739_s8, 4  ;;  %s529_s12 = int_to_ptr.vmem [resolvable:$true] %s528_s12 }
  0x13   :  { %668 = vmatpush3.bf16.msra.mxu0 %v665_v22  ;;  %682 = vmatprep.subr.bf16.mxu1 %v681_v26  ;;  %s711_s13 = scalar_lea.vmem %s529_s12, 16  ;;  %s715_s14 = scalar_lea.vmem %s529_s12, 32 }
  0x14   :  { %686 = vmatprep.subr.bf16.mxu0 %v685_v29  ;;  %p712_p0 = scmp.ne.s32.totalorder %s529_s12, %s711_s13  ;;  %p716_p1 = scmp.lt.s32.totalorder %s529_s12, %s529_s12 }
  0x15   :  { %p717_p2 = scmp.lt.s32.totalorder %s715_s14, %s711_s13 }
  0x16   :  { %603 = vmatmul.mubr.msk.f32.vlgmr.msra.gmra.mrb[0].mxu0 %vm58_vm0, %v42_v23  ;;  %684 = vmatpush3.bf16.msra.mxu1 %v681_v26 }
  0x17   :  { %688 = vmatpush3.bf16.msra.mxu0 %v685_v29  ;;  %694 = vmatprep.subr.bf16.mxu1 %v693_v42  ;;  %p718_p3 = por %p717_p2, %p716_p1 }
  0x18   :  { %690 = vmatprep.subr.bf16.mxu0 %v689_v39 }
  0x19   :  { %p719_p4 = pnand %p718_p3, %p712_p0 }
  0x1b   :  { %692 = vmatpush3.bf16.msra.mxu0 %v689_v39 }
  0x1c   :  { %701 = vmatprep.subr.bf16.mxu0 %v735_v60 }
  0x90   :  { %v434_v12 = vpop.permute.xlu0 %433 }
  0x91   :  { %v439_v13 = vrot.slane %v434_v12, %v438_v11 }
  0xe9   :  { %v604_v31 = vpop.f32.mrb[0].mxu0 }
  0xea   :  { %v137_v32 = vadd.f32 %v604_v31, %v536_v30  ;;  %v131_v33 = vpop.f32.mrb[1].mxu0 }
  0xeb   :  { %v132_v34 = vadd.f32 %v536_v30, %v131_v33 }
  0xec   :  { %v141_v36 = vmax.f32 %v137_v32, 0.0 }
  0xed   :  { %v140_v35 = vmax.f32 %v132_v34, 0.0 }
  0xef   :  { %621 = vmatprep.mubr.msk.f32.mxu1 %vm58_vm0, %v140_v35 }
  0xf0   :  { %622 = vmatmul.mubr.msk.f32.vlgmr.msra.gmra.mrb[0].mxu1 %vm58_vm0, %v141_v36 }
  0xf1   :  { %696 = vmatpush3.bf16.msra.mxu1 %v693_v42 }
  0xf2   :  { %698 = vmatprep.subr.bf16.mxu1 %v697_v52 }
  0xf5   :  { %700 = vmatpush3.bf16.msra.mxu1 %v697_v52 }
 0x1c3   :  { %v623_v44 = vpop.f32.mrb[0].mxu1 }
 0x1c4   :  { %v235_v45 = vadd.f32 %v623_v44, %v539_v43  ;;  %v229_v46 = vpop.f32.mrb[1].mxu1 }
 0x1c5   :  { %v230_v47 = vadd.f32 %v539_v43, %v229_v46 }
 0x1c6   :  { %v239_v49 = vmax.f32 %v235_v45, 0.0 }
 0x1c7   :  { %v238_v48 = vmax.f32 %v230_v47, 0.0 }
 0x1c9   :  { %632 = vmatprep.mubr.msk.f32.mxu0 %vm251_vm1, %v238_v48 }
 0x1ca   :  { %633 = vmatmul.mubr.msk.f32.vlgmr.msra.gmra.mrb[2].mxu0 %vm251_vm1, %v239_v49 }
 0x1cb   :  { %650 = vmatprep.mubr.msk.f32.mxu0 %vm736_vm2, %v737_v61 }
 0x29d   :  { %v634_v54 = vpop.f32.mrb[2].mxu0 }
 0x29e   :  { %v330_v55 = vadd.f32 %v634_v54, %v542_v53  ;;  %v324_v56 = vpop.f32.mrb[3].mxu0 }
 0x29f   :  { %v325_v57 = vadd.f32 %v542_v53, %v324_v56 }
 0x2a0   :  { %v334_v59 = vmax.f32 %v330_v55, 0.0 }
 0x2a1   :  { %v333_v58 = vmax.f32 %v325_v57, 0.0 }
 0x2a3   :  { %643 = vmatprep.mubr.msk.f32.mxu1 %vm251_vm1, %v333_v58 }
 0x2a4   :  { %644 = vmatmul.mubr.msk.f32.vlgmr.msra.gmra.mrb[2].mxu1 %vm251_vm1, %v334_v59 }
 0x377   :  { %v645_v1 = vpop.f32.mrb[2].mxu1 }
 0x378   :  { %v424_v2 = vadd.f32 %v645_v1, %v545_v0  ;;  %v418_v3 = vpop.f32.mrb[3].mxu1 }
 0x379   :  { %v419_v4 = vadd.f32 %v545_v0, %v418_v3 }
 0x37a   :  { %v428_v5 = vmax.f32 %v424_v2, 0.0 }
 0x37b   :  { %v427_v6 = vmax.f32 %v419_v4, 0.0 }
 0x37d   :  { %v702_v7 = vpack.c.bf16 %v428_v5, %v427_v6 }
 0x37f   :  { %704 = vmatpush3.bf16.xpose.msk.msra.mxu0 %vm703_vm4, %v702_v7 }
 0x386   :  { %651 = vmatmul.mubr.msk.f32.vlgmr.msra.gmra.mrb[4].mxu0 %vm440_vm3, %v429_v8 }
 0x459   :  { %v516_v14 = vpop.f32.mrb[4].mxu0 }
 0x45a   :  { %v517_v15 = vadd.f32 %v516_v14, %v439_v13  ;;  %v652_v16 = vpop.f32.mrb[5].mxu0 }
 0x45c   :  { %521 = vst.msk [vmem:[#allocation3] sm:$0x1] %vm520_vm5, %v517_v15 }
 0x45d   :  { %722 = shalt.err (!%p719_p4)
}
 0x45e   :  { %s723_s16 = scalar_lea.hbm %s927_s11, 16 }
 0x45f   :  { %p724_p5 = scmp.ne.s32.totalorder %s927_s11, %s723_s16  ;;  %p727_p6 = scmp.lt.u32.totalorder %s723_s16, %s927_s11 }
 0x461   :  { %p729_p7 = pnand %p727_p6, %p724_p5 }
 0x463   :  { %732 = shalt.err (!%p729_p7)
}
 0x464   :  { %531 = dma.vmem_to_hbm [thread:$0]  %s529_s12, 16, %s927_s11, [#allocation4]  }
 0x465   :  { %733 = dma.done.wait [#allocation4], 16  }
 0x466   :  { %734 = vsyncadd [#allocation4], 4294967280 }
 0x467   :  { %535 = vsyncpa [#allocation4], 1 }

</bundles_post_ra>
